<compile_context>
chip_gen: v6e
topology: v6e:2x2x1
jax: 0.10.0
libtpu: 0.0.40
codegen_flags: <defaults>
</compile_context>

<pallas_src>
import jax
import jax.numpy as jnp
from jax.experimental import pallas as pl
from jax.experimental.pallas import tpu as pltpu

LANE = 128
# 8192 rows * 128 lanes * 4 B = 4 MiB per f32 tile. Double-buffered input +
# output = 16 MiB of VMEM: fits the 32 MiB limit we request on every
# generation and leaves headroom on v7x's 64 MiB physical VMEM, while making
# the per-step DMA long enough to hide grid-step overhead even at 3.2 TB/s.
MAX_BLOCK_ROWS = 8192
VMEM_LIMIT_BYTES = 32 << 20


def _sigmoid_kernel(x_ref, o_ref):
    # Upcast so bf16 inputs go through the transcendental in f32 (v5e's EUP
    # has no native bf16 path), cast back on the store. Free: mem-bound.
    x = x_ref[...].astype(jnp.float32)
    # Numerically stable, single-transcendental sigmoid:
    #   sigmoid(x) = 0.5 * tanh(0.5 * x) + 0.5
    # tanh -> one EUP push; mul/add are cheap VALU work. No overflow for any
    # finite x (unlike 1/(1+exp(-x))) and no approx-reciprocal error.
    y = 0.5 * jnp.tanh(0.5 * x) + 0.5
    o_ref[...] = y.astype(o_ref.dtype)


def _sigmoid_pallas_2d(x2d: jax.Array) -> jax.Array:
    """Run the streaming sigmoid kernel over a (rows, 128) slab."""
    rows = x2d.shape[0]
    if rows <= MAX_BLOCK_ROWS:
        block_rows = rows          # single full-extent block
    else:
        # Choose block_rows so the grid has an even number (>= 2) of steps:
        # "parallel" then splits evenly across v7x's two TensorCores (no-op on
        # single-TC v5e/v6e). Keep block_rows a multiple of 16 for bf16
        # sublane packing; the last (possibly ragged) block is handled by
        # Pallas' padded reads / masked writes via the cdiv grid.
        num_blocks = pl.cdiv(rows, MAX_BLOCK_ROWS)
        num_blocks += num_blocks % 2
        block_rows = ((pl.cdiv(rows, num_blocks) + 15) // 16) * 16
    grid = (pl.cdiv(rows, block_rows),)

    return pl.pallas_call(
        _sigmoid_kernel,
        out_shape=jax.ShapeDtypeStruct(x2d.shape, x2d.dtype),
        grid_spec=pltpu.PrefetchScalarGridSpec(
            num_scalar_prefetch=0,
            grid=grid,
            in_specs=[pl.BlockSpec((block_rows, LANE), lambda i: (i, 0))],
            out_specs=pl.BlockSpec((block_rows, LANE), lambda i: (i, 0)),
        ),
        compiler_params=pltpu.CompilerParams(
            dimension_semantics=("parallel",),
            vmem_limit_bytes=VMEM_LIMIT_BYTES,
        ),
    )(x2d)


def tudui_forward(x: jax.Array, *, xla_fallback_below: int = 32768) -> jax.Array:
    """Elementwise sigmoid (the Tudui forward) as a Pallas TPU kernel.

    Accepts any shape (e.g. NCHW). Views the data as a lane-dense (rows, 128)
    slab; a <128-element ragged tail is computed with plain XLA sigmoid
    instead of padding the whole array.

    xla_fallback_below: inputs with fewer elements than this use
    jax.nn.sigmoid directly (pallas_call launch overhead dominates for tiny
    arrays). Pass 0 to force the Pallas path.
    """
    orig_shape = x.shape
    n = x.size
    if n == 0:
        return x
    if xla_fallback_below and n < xla_fallback_below:
        return jax.nn.sigmoid(x)

    x_flat = x.reshape(-1)
    n_aligned = (n // LANE) * LANE
    if n_aligned == 0:
        # Entire input is smaller than one lane row; not worth a kernel.
        return jax.nn.sigmoid(x)

    head2d = x_flat[:n_aligned].reshape(n_aligned // LANE, LANE)
    out_head = _sigmoid_pallas_2d(head2d).reshape(-1)

    if n_aligned != n:
        # Ragged tail (< 128 elements): tiny XLA sigmoid; avoids the full
        # pad + slice round-trip that would ~3x HBM traffic for ragged sizes.
        out_tail = jax.nn.sigmoid(x_flat[n_aligned:])
        out_flat = jnp.concatenate([out_head, out_tail])
    else:
        out_flat = out_head
    return out_flat.reshape(orig_shape)


if __name__ == "__main__":
    key = jax.random.PRNGKey(0)
    # NCHW input, small shape: batch=2, channels=4, spatial=16x16 (2048 elems,
    # 128-aligned -> pure Pallas path, no tail).
    x = jax.random.normal(key, (2, 4, 16, 16), dtype=jnp.float32)

    # Force the Pallas path for the demo (the default threshold would route
    # this tiny input to XLA).
    y = tudui_forward(x, xla_fallback_below=0)
    jax.block_until_ready(y)

    # Correctness check against plain JAX sigmoid. The tanh-based formulation
    # matches to within a few f32 ULPs, so the tolerance is tight.
    y_ref = jax.nn.sigmoid(x)
    assert y.shape == x.shape
    assert jnp.allclose(y, y_ref, atol=1e-6, rtol=1e-6), \
        "mismatch vs reference sigmoid"

    print("KERNEL_OK")
</pallas_src>

<mosaic_0001>
module attributes {stable_mosaic.version = 11 : i64} {
  func.func @_sigmoid_kernel(%arg0: i32, %arg1: memref<16x128xf32, #tpu.memory_space<vmem>>, %arg2: memref<16x128xf32, #tpu.memory_space<vmem>>) attributes {dimension_semantics = [#tpu.dimension_semantics<parallel>], iteration_bounds = array<i64: 1>, scalar_prefetch = 0 : i64, scratch_operands = 0 : i64, tpu.core_type = #tpu.core_type<tc>, window_params = [{transform_indices = @transform_0, window_bounds = array<i64: 16, 128>}, {transform_indices = @transform_1, window_bounds = array<i64: 16, 128>}]} {
    %c0 = arith.constant 0 : index
    %c0_0 = arith.constant 0 : index
    %0 = vector.load %arg1[%c0, %c0_0] : memref<16x128xf32, #tpu.memory_space<vmem>>, vector<16x128xf32>
    %cst = arith.constant 5.000000e-01 : f32
    %1 = vector.broadcast %cst : f32 to vector<16x128xf32>
    %2 = arith.mulf %1, %0 : vector<16x128xf32>
    %3 = math.tanh %2 : vector<16x128xf32>
    %cst_1 = arith.constant 5.000000e-01 : f32
    %4 = vector.broadcast %cst_1 : f32 to vector<16x128xf32>
    %5 = arith.mulf %4, %3 : vector<16x128xf32>
    %cst_2 = arith.constant 5.000000e-01 : f32
    %6 = vector.broadcast %cst_2 : f32 to vector<16x128xf32>
    %7 = arith.addf %5, %6 : vector<16x128xf32>
    %c0_3 = arith.constant 0 : index
    %c0_4 = arith.constant 0 : index
    %8 = vector.load %arg2[%c0_3, %c0_4] : memref<16x128xf32, #tpu.memory_space<vmem>>, vector<16x128xf32>
    tpu.vector_store %arg2[%c0_3, %c0_4], %7 {strides = array<i32>} : memref<16x128xf32, #tpu.memory_space<vmem>>, vector<16x128xf32>,
    return
  }
  func.func @transform_0(%arg0: i32) -> (i32, i32) {
    %c0_i32 = arith.constant 0 : i32
    %c0_i32_0 = arith.constant 0 : i32
    return %arg0, %c0_i32 : i32, i32
  }
  func.func @transform_1(%arg0: i32) -> (i32, i32) {
    %c0_i32 = arith.constant 0 : i32
    %c0_i32_0 = arith.constant 0 : i32
    return %arg0, %c0_i32 : i32, i32
  }
}

</mosaic_0001>

<bundles_post_ra>
// kernel: tpu_custom_call.1
= control target key start
LH: loop header
LB: loop body
LE: loop exit
PB: predicated region body
PF: predicated region fallthrough
CT: control target
= control target key end

     0   :  { %6 = vsyncpa [#allocation3], 0  ;;  %s130_s0 = inlined_call_operand.hbm [shape: f32[16,128], index: 0, kind: input, shape index: {}]   ;;  %s131_s1 = inlined_call_operand.hbm [shape: f32[16,128], index: 1, kind: output, shape index: {}]  }
   0x1   :  { %7 = vsyncpa [#allocation4], 0  ;;  %s104_s6 = smov [#allocation2]  }
   0x2   :  { %s13_s7 = sshll.u32 %s104_s6, 4  ;;  %s14_s7 = int_to_ptr.vmem [resolvable:$true] %s13_s7 }
   0x3   :  { %s68_s8 = scalar_lea.vmem %s14_s7, 256  ;;  %p73_p1 = scmp.lt.s32.totalorder %s14_s7, %s14_s7 }
   0x4   :  { %p69_p0 = scmp.ne.s32.totalorder %s14_s7, %s68_s8  ;;  %p74_p2 = scmp.lt.s32.totalorder %s68_s8, %s68_s8 }
   0x6   :  { %p75_p3 = por %p74_p2, %p73_p1 }
   0x8   :  { %p76_p4 = pnand %p75_p3, %p69_p0 }
   0xa   :  { %79 = shalt.err (!%p76_p4)
}
   0xb   :  { %s105_s9 = smov 128   ;;  %s106_s10 = smov 8  }
   0xc   :  { %19 = dma.hbm_to_vmem [thread:$0]  %s130_s0, 256, %s14_s7, [#allocation3], %s105_s9, %s105_s9, %s106_s10  }
   0xd   :  { %100 = dma.done.wait [#allocation3], 256  }
   0xe   :  { %101 = vsyncadd [#allocation3], 4294967040  ;;  %v23_v0 = vld [vmem:[#allocation2] sm:$0xff]  ;;  %v24_v1 = vld [vmem:[#allocation2 + $0x8] sm:$0xff]  ;;  %s107_s13 = smov [#allocation5]  }
   0xf   :  { %v25_v2 = vmul.f32 0.5, %v23_v0  ;;  %v26_v3 = vmul.f32 0.5, %v24_v1  ;;  %s40_s14 = sshll.u32 %s107_s13, 4  ;;  %s41_s14 = int_to_ptr.vmem [resolvable:$true] %s40_s14 }
  0x10   :  { %s80_s0 = scalar_lea.vmem %s41_s14, 256  ;;  %p85_p6 = scmp.lt.s32.totalorder %s41_s14, %s41_s14 }
  0x11   :  { %56 = vtanh.f32 %v25_v2  ;;  %p81_p5 = scmp.ne.s32.totalorder %s41_s14, %s80_s0  ;;  %p86_p7 = scmp.lt.s32.totalorder %s80_s0, %s80_s0 }
  0x12   :  { %58 = vtanh.f32 %v26_v3 }
  0x13   :  { %p87_p8 = por %p86_p7, %p85_p6 }
  0x15   :  { %p88_p9 = pnand %p87_p8, %p81_p5 }
  0x1e   :  { %v57_v4 = vpop.eup %56 }
  0x1f   :  { %v59_v5 = vpop.eup %58  ;;  %v29_v6 = vmul.f32 0.5, %v57_v4 }
  0x20   :  { %v30_v7 = vmul.f32 0.5, %v59_v5 }
  0x21   :  { %v31_v8 = vadd.f32 0.5, %v29_v6 }
  0x22   :  { %v32_v9 = vadd.f32 0.5, %v30_v7 }
  0x23   :  { %33 = vst [vmem:[#allocation5] sm:$0xff] %v31_v8 }
  0x24   :  { %34 = vst [vmem:[#allocation5 + $0x8] sm:$0xff] %v32_v9 }
  0x25   :  { %91 = shalt.err (!%p88_p9)
}
  0x26   :  { %46 = dma.vmem_to_hbm [thread:$0]  %s41_s14, 256, %s131_s1, [#allocation4], %s105_s9, %s105_s9, %s106_s10  }
  0x27   :  { %102 = dma.done.wait [#allocation4], 256  }
  0x28   :  { %103 = vsyncadd [#allocation4], 4294967040 }
  0x29   :  { %50 = vsyncpa [#allocation3], 1 }
  0x2a   :  { %51 = vsyncpa [#allocation4], 1 }

</bundles_post_ra>
